<compile_context>
chip_gen: v7x
topology: tpu7x:2x2x1
jax: 0.10.0
libtpu: 0.0.40
codegen_flags: <defaults>
</compile_context>

<pallas_src>
import jax
import jax.numpy as jnp
from jax.experimental import pallas as pl
from jax.experimental.pallas import tpu as pltpu

KH = KW = 3
STRIDE = 2
PAD = 1
LANE = 128
SUBLANE = 8
TM_TARGET = 512  # output columns (lanes) per grid step


def _round_up(a, b):
    return (a + b - 1) // b * b


def fused_conv_relu_kernel(w_ref, b_ref, p_ref, o_ref):
    # w_ref : (COUT_P, K_PAD)  folded weight 2*(w1+w2), transposed, K zero-padded
    # b_ref : (COUT_P, 1)      folded bias   2*(b1+b2)
    # p_ref : (K_PAD, TM)      im2col patches (K on sublanes, M on lanes)
    # o_ref : (COUT_P, TM)     lane-dense output tile (TM % 128 == 0)
    acc = jnp.dot(w_ref[...], p_ref[...], preferred_element_type=jnp.float32)
    o_ref[...] = jnp.maximum(acc + b_ref[...], 0.0).astype(o_ref.dtype)


def model_forward(x_nchw, w1, b1, w2, b2, mxu_dtype=None):
    """x_nchw: (N, Cin, H, W) f32.  w*: (KH, KW, Cin, Cout) HWIO.  Returns NCHW."""
    N, Cin, H, W = x_nchw.shape
    Cout = w1.shape[-1]
    Ho = (H + 2 * PAD - KH) // STRIDE + 1
    Wo = (W + 2 * PAD - KW) // STRIDE + 1
    K = KH * KW * Cin
    M = N * Ho * Wo

    # ---- algebraic fold of the 4-way add --------------------------------
    # v1+v2+v3+v4 = 2*conv(x,w1) + 2*conv(x,w2) = conv(x, 2*(w1+w2)) + 2*(b1+b2)
    w_sum = 2.0 * (w1 + w2)                      # (KH, KW, Cin, Cout)
    b_sum = 2.0 * (b1 + b2)                      # (Cout,)

    # ---- im2col (transposed) directly from NCHW -------------------------
    xp = jnp.pad(x_nchw, ((0, 0), (0, 0), (PAD, PAD), (PAD, PAD)))
    slices = [
        xp[:, :, kh:kh + STRIDE * (Ho - 1) + 1:STRIDE,
               kw:kw + STRIDE * (Wo - 1) + 1:STRIDE]
        for kh in range(KH) for kw in range(KW)
    ]                                            # each (N, Cin, Ho, Wo)
    patches = jnp.stack(slices, axis=2)          # (N, Cin, KH*KW, Ho, Wo)
    # feature order k = cin*9 + kh*3 + kw; M order m = n*Ho*Wo + ho*Wo + wo
    patches_t = jnp.transpose(patches, (1, 2, 0, 3, 4)).reshape(K, M)

    # ---- padding: K -> 32 (aligned, zero rows are free), M -> lane/TM mult
    K_PAD = _round_up(K, 32)
    COUT_P = _round_up(Cout, SUBLANE)
    TM = min(TM_TARGET, _round_up(M, LANE))
    M_pad = _round_up(M, TM)

    patches_t = jnp.pad(patches_t, ((0, K_PAD - K), (0, M_pad - M)))

    w_t = jnp.pad(w_sum.transpose(2, 0, 1, 3).reshape(K, Cout).T,   # (Cout, K)
                  ((0, COUT_P - Cout), (0, K_PAD - K)))             # (COUT_P, K_PAD)
    b_col = jnp.pad(b_sum, (0, COUT_P - Cout)).reshape(COUT_P, 1)

    if mxu_dtype is not None:                    # v6e/v7x bf16-MXU option
        patches_t = patches_t.astype(mxu_dtype)
        w_t = w_t.astype(mxu_dtype)

    grid = (M_pad // TM,)
    cost = pl.CostEstimate(
        flops=2 * M_pad * K_PAD * COUT_P,
        transcendentals=0,
        bytes_accessed=(patches_t.size * patches_t.dtype.itemsize
                        + w_t.size * w_t.dtype.itemsize
                        + b_col.size * b_col.dtype.itemsize
                        + COUT_P * M_pad * 4),
    )

    out_t = pl.pallas_call(
        fused_conv_relu_kernel,
        out_shape=jax.ShapeDtypeStruct((COUT_P, M_pad), jnp.float32),
        grid=grid,
        in_specs=[
            pl.BlockSpec((COUT_P, K_PAD), lambda i: (0, 0)),   # folded weight
            pl.BlockSpec((COUT_P, 1), lambda i: (0, 0)),       # folded bias
            pl.BlockSpec((K_PAD, TM), lambda i: (0, i)),       # patch tile
        ],
        out_specs=pl.BlockSpec((COUT_P, TM), lambda i: (0, i)),
        compiler_params=pltpu.CompilerParams(
            dimension_semantics=("parallel",),
            allow_input_fusion=[False, False, True],
        ),
        cost_estimate=cost,
    )(w_t, b_col, patches_t)

    out = out_t[:Cout, :M].reshape(Cout, N, Ho, Wo)      # strip padding (free)
    return jnp.transpose(out, (1, 0, 2, 3))              # -> NCHW


def reference_forward(x_nchw, w1, b1, w2, b2):
    """Pure-JAX reference (lax conv) for correctness check."""
    dn = jax.lax.conv_dimension_numbers(
        x_nchw.shape, (KH, KW, w1.shape[2], w1.shape[3]), ("NCHW", "HWIO", "NCHW"))

    def conv(x, w, b):
        y = jax.lax.conv_general_dilated(
            x, w, window_strides=(STRIDE, STRIDE),
            padding=((PAD, PAD), (PAD, PAD)), dimension_numbers=dn)
        return y + b.reshape(1, -1, 1, 1)

    v1 = conv(x_nchw, w1, b1)
    v2 = conv(x_nchw, w1, b1)
    v3 = conv(x_nchw, w2, b2)
    v4 = conv(x_nchw, w2, b2)
    return jnp.maximum(v1 + v2 + v3 + v4, 0.0)


if __name__ == "__main__":
    key = jax.random.PRNGKey(0)
    k_x, k_w1, k_b1, k_w2, k_b2 = jax.random.split(key, 5)

    # Shapes implied by the module: Cin=3, 64x64 spatial (batch widened to 2).
    N, Cin, H, W, Cout = 2, 3, 64, 64, 8
    x = jax.random.normal(k_x, (N, Cin, H, W), dtype=jnp.float32)

    # PyTorch-like init: uniform(-k, k), k = 1/sqrt(Cin*3*3).
    bound = 1.0 / (Cin * KH * KW) ** 0.5
    w1 = jax.random.uniform(k_w1, (KH, KW, Cin, Cout), jnp.float32, -bound, bound)
    b1 = jax.random.uniform(k_b1, (Cout,), jnp.float32, -bound, bound)
    w2 = jax.random.uniform(k_w2, (KH, KW, Cin, Cout), jnp.float32, -bound, bound)
    b2 = jax.random.uniform(k_b2, (Cout,), jnp.float32, -bound, bound)

    out = model_forward(x, w1, b1, w2, b2)        # f32 MXU path (strict tolerance)
    out = jax.block_until_ready(out)

    ref = reference_forward(x, w1, b1, w2, b2)
    assert out.shape == ref.shape, (out.shape, ref.shape)
    err = float(jnp.max(jnp.abs(out - ref)))
    assert err < 1e-4, err

    print("KERNEL_OK")
</pallas_src>

<mosaic_0001>
module attributes {stable_mosaic.version = 11 : i64} {
  func.func @fused_conv_relu_kernel(%arg0: i32, %arg1: memref<8x32xf32, #tpu.memory_space<vmem>>, %arg2: memref<8x1xf32, #tpu.memory_space<vmem>>, %arg3: memref<32x512xf32, #tpu.memory_space<vmem>>, %arg4: memref<8x512xf32, #tpu.memory_space<vmem>>) attributes {dimension_semantics = [#tpu.dimension_semantics<parallel>], iteration_bounds = array<i64: 4>, scalar_prefetch = 0 : i64, scratch_operands = 0 : i64, tpu.core_type = #tpu.core_type<tc>, window_params = [{pipeline_mode = #tpu.pipeline_mode<synchronous>, transform_indices = @transform_0, window_bounds = array<i64: 8, 32>}, {pipeline_mode = #tpu.pipeline_mode<synchronous>, transform_indices = @transform_1, window_bounds = array<i64: 8, 1>}, {transform_indices = @transform_2, window_bounds = array<i64: 32, 512>}, {transform_indices = @transform_3, window_bounds = array<i64: 8, 512>}]} {
    %c0 = arith.constant 0 : index
    %c0_0 = arith.constant 0 : index
    %0 = vector.load %arg1[%c0, %c0_0] : memref<8x32xf32, #tpu.memory_space<vmem>>, vector<8x32xf32>
    %c0_1 = arith.constant 0 : index
    %c0_2 = arith.constant 0 : index
    %1 = vector.load %arg3[%c0_1, %c0_2] : memref<32x512xf32, #tpu.memory_space<vmem>>, vector<32x512xf32>
    %cst = arith.constant dense<0.000000e+00> : vector<8x512xf32>
    %2 = tpu.matmul %0, %1, %cst {dimension_numbers = #tpu.dot_dimension_numbers<[1], [0], [0], [1], [0, 0, 1, 1], [], []>} : vector<8x32xf32>, vector<32x512xf32>, vector<8x512xf32> -> vector<8x512xf32>
    %c0_3 = arith.constant 0 : index
    %c0_4 = arith.constant 0 : index
    %3 = vector.load %arg2[%c0_3, %c0_4] : memref<8x1xf32, #tpu.memory_space<vmem>>, vector<8x1xf32>
    %4 = vector.broadcast %3 : vector<8x1xf32> to vector<8x512xf32>
    %5 = arith.addf %2, %4 : vector<8x512xf32>
    %cst_5 = arith.constant 0.000000e+00 : f32
    %6 = vector.broadcast %cst_5 : f32 to vector<8x512xf32>
    %7 = arith.maximumf %5, %6 : vector<8x512xf32>
    %c0_6 = arith.constant 0 : index
    %c0_7 = arith.constant 0 : index
    %8 = vector.load %arg4[%c0_6, %c0_7] : memref<8x512xf32, #tpu.memory_space<vmem>>, vector<8x512xf32>
    tpu.vector_store %arg4[%c0_6, %c0_7], %7 {strides = array<i32>} : memref<8x512xf32, #tpu.memory_space<vmem>>, vector<8x512xf32>,
    return
  }
  func.func @transform_0(%arg0: i32) -> (i32, i32) {
    %c0_i32 = arith.constant 0 : i32
    %c0_i32_0 = arith.constant 0 : i32
    %c0_i32_1 = arith.constant 0 : i32
    return %c0_i32, %c0_i32_0 : i32, i32
  }
  func.func @transform_1(%arg0: i32) -> (i32, i32) {
    %c0_i32 = arith.constant 0 : i32
    %c0_i32_0 = arith.constant 0 : i32
    %c0_i32_1 = arith.constant 0 : i32
    return %c0_i32, %c0_i32_0 : i32, i32
  }
  func.func @transform_2(%arg0: i32) -> (i32, i32) {
    %c0_i32 = arith.constant 0 : i32
    %c0_i32_0 = arith.constant 0 : i32
    return %c0_i32, %arg0 : i32, i32
  }
  func.func @transform_3(%arg0: i32) -> (i32, i32) {
    %c0_i32 = arith.constant 0 : i32
    %c0_i32_0 = arith.constant 0 : i32
    return %c0_i32, %arg0 : i32, i32
  }
}

</mosaic_0001>

<bundles_post_ra>
// kernel: tpu_custom_call.1
= control target key start
LH: loop header
LB: loop body
LE: loop exit
PB: predicated region body
PF: predicated region fallthrough
CT: control target
= control target key end

     0   :  { %8 = vsyncpa [#allocation3], 0  ;;  %s849_s0 = inlined_call_operand.vmem [shape: f32[8,32], index: 0, kind: input, shape index: {}]   ;;  %s850_s1 = inlined_call_operand.vmem [shape: f32[8,1], index: 1, kind: input, shape index: {}]   ;;  %s851_s2 = inlined_call_operand.hbm [shape: f32[32,2048], index: 2, kind: input, shape index: {}]   ;;  %s852_s3 = inlined_call_operand.hbm [shape: f32[8,2048], index: 3, kind: output, shape index: {}]  }
   0x1   :  { %10 = vsyncpa [#allocation3 + $0x1], 0 }
   0x2   :  { %11 = vsyncpa [#allocation4], 0 }
   0x3   :  { %13 = vsyncpa [#allocation4 + $0x1], 0  ;;  %s664_s12 = smov 0   ;;  %s666_s13 = smov 0  }
   0x4   :  { %s668_s14 = smov 0   ;;  %s670_s15 = smov 0  }
   0x5 LB: > { %s685_s16 = sadd.s32 4294967295, %s635_s15   ;;  %s453_s17 = sadd.s32 4294967294, %s635_s15   ;;  %s635_s15 = sphi %s670_s15, %s865_s15   ;;  %s631_s14 = sphi %s668_s14, %s864_s14   ;;  %s627_s13 = sphi %s666_s13, %s863_s13   ;;  %s623_s12 = sphi %s664_s12, %s862_s12  }
   0x6   : > { %s689_s18 = sadd.s32 1, %s635_s15   ;;  %s68_s19 = sadd.s32 1, %s631_s14 }
   0x7   : > { %s65_s20 = ssub.s32 %s635_s15, %s689_s18  ;;  %p75_p0 = scmp.ne.s32.totalorder %s631_s14, %s627_s13 }
   0x8   : > { %p66_p1 = scmp.eq.s32.totalorder %s65_s20, 0  ;;  %p76_p2 = scmp.eq.s32.totalorder %s635_s15, 0 }
   0x9   : > { %p81_p3 = scmp.ne.s32.totalorder %s627_s13, %s623_s12  ;;  %p82_p4 = scmp.eq.s32.totalorder %s685_s16, 0 }
   0xa   : > { %s701_s21 = scalar_select %p66_p1, %s631_s14, %s68_s19  }
   0xb   : > { %p703_p5 = por %p76_p2, %p75_p0  ;;  %p707_p6 = por %p82_p4, %p81_p3 }
   0xc   : > { %p105_p7 = scmp.eq.s32.totalorder %s685_s16, 3  ;;  %p111_p8 = scmp.eq.s32.totalorder %s453_s17, 3 }
   0xd   : > { %p499_p9 = scmp.lt.s32.totalorder %s635_s15, 4  ;;  %s137_s26 = sand.u32 1, %s631_s14  }
   0xe   : > { %p713_p10 = por %p105_p7, %p75_p0  ;;  %p717_p11 = por %p111_p8, %p81_p3 }
   0xf   : > { %s469_s27 = sshll.u32 %s635_s15, 9  ;;  %s456_s28 = sshll.u32 %s137_s26, 7 }
  0x10   : > { %s856_s24 = scalar_select %p713_p10, 1, 0 }
  0x11   : > { %s857_s25 = scalar_select %p717_p11, 1, 0 }
  0x12   : > { %s726_s4 = scalar_lea.hbm %s851_s2, %s469_s27  ;;  %s141_s5 = scalar_lea.vmem [#allocation2], %s456_s28 }
  0x13   : > { %s148_s6 = sshll.u32 %s141_s5, 4  ;;  %p730_p12 = pnand %p499_p9, %p703_p5  ;;  %s734_s6 = int_to_ptr.vmem [resolvable:$true] %s148_s6 }
  0x14   : > { %s737_s8 = scalar_lea.sflag [#allocation3], %s137_s26  ;;  %s539_s9 = scalar_lea.hbm %s726_s4, 2048 }
  0x15   : > { %p540_p0 = scmp.ne.s32.totalorder %s726_s4, %s539_s9  ;;  %p541_p1 = pneg %p730_p12 }
  0x16   : > { %s544_s17 = scalar_lea.hbm %s851_s2, 8192  ;;  %p545_p4 = scmp.lt.u32.totalorder %s726_s4, %s851_s2 }
  0x17   : > { %p542_p2 = pnand %p541_p1, %p540_p0  ;;  %p546_p5 = scmp.lt.u32.totalorder %s544_s17, %s539_s9 }
  0x18   : > { %p548_p8 = scmp.lt.u32.totalorder %s539_s9, %s726_s4 }
  0x19   : > { %p543_p3 = pneg %p542_p2  ;;  %p547_p7 = por %p546_p5, %p545_p4 }
  0x1b   : > { %p549_p9 = por %p548_p8, %p547_p7 }
  0x1d   : > { %p550_p13 = pnand %p549_p9, %p543_p3 }
  0x1f   : > { %553 = shalt.err (!%p550_p13)
}
  0x20   : > { %s554_s22 = scalar_lea.vmem %s734_s6, 2048  ;;  %s637_s26 = smov [#allocation2]  }
  0x21   : > { %p555_p0 = scmp.ne.s32.totalorder %s734_s6, %s554_s22  ;;  %s559_s27 = sshll.u32 %s637_s26, 4  ;;  %s560_s27 = int_to_ptr.vmem [resolvable:$false] %s559_s27 }
  0x22   : > { %s561_s28 = scalar_lea.vmem %s560_s27, 4096  ;;  %p562_p10 = scmp.lt.s32.totalorder %s734_s6, %s560_s27 }
  0x23   : > { %p557_p2 = pnand %p555_p0, %p541_p1  ;;  %p563_p4 = scmp.lt.s32.totalorder %s561_s28, %s554_s22 }
  0x25   : > { %p558_p11 = pneg %p557_p2  ;;  %p564_p5 = por %p563_p4, %p562_p10 }
  0x27   : > { %p565_p7 = pnand %p564_p5, %p558_p11 }
  0x29   : > { %568 = shalt.err (!%p565_p7)
}
  0x2a   : > { %s638_s29 = smov 2048   ;;  %s639_s30 = smov 512  }
  0x2b   : > { %s640_s5 = smov 32   ;;  %p156_p13 = scmp.lt.s32.totalorder %s635_s15, 5 }
  0x2c   : > { %494 = dma.hbm_to_vmem [thread:$0]  (!%p730_p12), %s726_s4, 2048, %s734_s6, %s737_s8, %s638_s29, %s639_s30, %s640_s5  }
  0x2d   : > { %p859_p1 = scmp.ge.s32.totalorder %s635_s15, 1 }
  0x2f   : > { %p157_p3 = pnand %p859_p1, %p156_p13 }
  0x30   : > { %s769_s9 = sand.u32 (!%p157_p3), 1, %s627_s13  }
  0x31   : > { %160 = sbr.rel (%p157_p3) target bundleno = 301 (0x12d), region = 32  ;;  %s460_s10 = sshll.u32 (!%p157_p3), %s769_s9, 7 }
  0x32   : > { %s163_s11 = scalar_lea.sflag (!%p157_p3), [#allocation3], %s769_s9  ;;  %s773_s17 = scalar_lea.vmem (!%p157_p3), [#allocation2], %s460_s10 }
  0x38   : > { %614 = dma.done.wait (%p707_p6), %s163_s11, 2048  }
  0x39   : > { %616 = vsyncadd (%p707_p6), %s163_s11, 4294965248  ;;  %v641_v0 = vmov 0.0   ;;  %v642_v1 = vmov 0   ;;  %v193_v2 = vld [vmem:[%s773_s17 + $0x8] sm:$0xff]  ;;  %v195_v4 = vld [vmem:[%s773_s17 + $0x18] sm:$0xff]  ;;  %vm214_vm0 = vcmask 261120  }
  0x3a   : > { %282 = vmatprep.mubr.f32.mxu0 %v641_v0  ;;  %353 = vmatprep.mubr.f32.mxu1 %v641_v0  ;;  %v197_v3 = vld [vmem:[%s773_s17 + $0x28] sm:$0xff]  ;;  %v199_v6 = vld [vmem:[%s773_s17 + $0x38] sm:$0xff]  ;;  %v192_v7 = vld [vmem:[%s773_s17] sm:$0xff]  ;;  %s461_s8 = sshll.u32 %s769_s9, 5  ;;  %s470_s19 = sshll.u32 %s685_s16, 9 }
  0x3b   : > { %538 = vset.pattern.permute.xlu0 %v642_v1  ;;  %v471_v5 = vpack.c.bf16 %v197_v3, %v193_v2  ;;  %v196_v8 = vld [vmem:[%s773_s17 + $0x20] sm:$0xff]  ;;  %v479_v9 = vpack.c.bf16 %v199_v6, %v195_v4  ;;  %v194_v11 = vld [vmem:[%s773_s17 + $0x10] sm:$0xff]  ;;  %v201_v13 = vld [vmem:[%s773_s17 + $0x48] sm:$0xff]  ;;  %s188_s20 = scalar_lea.vmem [#allocation5], %s461_s8  ;;  %s806_s28 = scalar_lea.hbm %s852_s3, %s470_s19 }
  0x3c   : > { %v473_v10 = vpack.c.bf16 %v196_v8, %v192_v7  ;;  %v198_v12 = vld [vmem:[%s773_s17 + $0x30] sm:$0xff]  ;;  %v205_v15 = vld [vmem:[%s773_s17 + $0x68] sm:$0xff]  ;;  %v203_v16 = vld [vmem:[%s773_s17 + $0x58] sm:$0xff]  ;;  %s383_s22 = sshll.u32 %s188_s20, 4  ;;  %s369_s16 = scalar_lea.sflag [#allocation4], %s769_s9  ;;  %s808_s22 = int_to_ptr.vmem [resolvable:$true] %s383_s22 }
  0x3d   : > { %472 = vmatprep.subr.bf16.mxu0 %v471_v5  ;;  %v481_v14 = vpack.c.bf16 %v198_v12, %v194_v11  ;;  %v207_v17 = vld [vmem:[%s773_s17 + $0x78] sm:$0xff]  ;;  %480 = vmatprep.subr.bf16.mxu1 %v479_v9  ;;  %v475_v18 = vpack.c.bf16 %v205_v15, %v201_v13  ;;  %v200_v20 = vld [vmem:[%s773_s17 + $0x40] sm:$0xff]  ;;  %v202_v22 = vld [vmem:[%s773_s17 + $0x50] sm:$0xff]  ;;  %s569_s29 = scalar_lea.vmem %s808_s22, 512  ;;  %p860_p10 = scmp.ne.s32.totalorder %s856_s24, 0 }
  0x3e   : > { %474 = vmatpush1.bf16.msra.mxu0 %v473_v10  ;;  %v483_v19 = vpack.c.bf16 %v207_v17, %v203_v16  ;;  %v204_v21 = vld [vmem:[%s773_s17 + $0x60] sm:$0xff]  ;;  %v206_v24 = vld [vmem:[%s773_s17 + $0x70] sm:$0xff]  ;;  %p570_p6 = scmp.ne.s32.totalorder %s808_s22, %s569_s29  ;;  %s643_s30 = smov [#allocation5]  }
  0x3f   : > { %482 = vmatpush1.bf16.msra.mxu1 %v481_v14  ;;  %v477_v23 = vpack.c.bf16 %v204_v21, %v200_v20  ;;  %v208_v25 = vld [vmem:[%s850_s1] sm:$0xff]  ;;  %476 = vmatprep.subr.bf16.mxu0 %v475_v18  ;;  %v485_v26 = vpack.c.bf16 %v206_v24, %v202_v22  ;;  %s573_s5 = sshll.u32 %s643_s30, 4  ;;  %s574_s5 = int_to_ptr.vmem [resolvable:$false] %s573_s5 }
  0x40   : > { %484 = vmatprep.subr.bf16.mxu1 %v483_v19  ;;  %211 = vperm.xlu0 %538, %v208_v25   ;;  %v191_v27 = vld [vmem:[%s849_s0] sm:$0xff]  ;;  %p571_p11 = pnand %p570_p6, %p860_p10  ;;  %s575_s10 = scalar_lea.vmem %s574_s5, 1024 }
  0x41   : > { %p576_p8 = scmp.lt.s32.totalorder %s808_s22, %s574_s5  ;;  %p577_p9 = scmp.lt.s32.totalorder %s575_s10, %s569_s29 }
  0x42   : > { %478 = vmatpush1.bf16.msra.mxu0 %v477_v23  ;;  %p572_p12 = pneg %p571_p11 }
  0x43   : > { %486 = vmatpush1.bf16.msra.mxu1 %v485_v26  ;;  %p578_p0 = por %p577_p9, %p576_p8 }
  0x45   : > { %462 = vmatmul.mubr.msk.f32.vlgmr.msra.gmra.mrb[0].mxu0 %vm214_vm0, %v191_v27  ;;  %p579_p2 = pnand %p578_p0, %p572_p12 }
  0x46   : > { %463 = vmatmul.mubr.msk.f32.vlgmr.msra.gmra.mrb[0].mxu1 %vm214_vm0, %v191_v27 }
  0xbf   : > { %v212_v28 = vpop.permute.xlu0 %211 }
 0x118   : > { %v284_v29 = vpop.f32.mrb[0].mxu0 }
 0x119   : > { %v285_v30 = vadd.f32 %v284_v29, %v212_v28  ;;  %v355_v31 = vpop.f32.mrb[0].mxu1  ;;  %v286_v32 = vpop.f32.mrb[1].mxu0 }
 0x11a   : > { %v356_v33 = vadd.f32 %v355_v31, %v212_v28  ;;  %v287_v34 = vadd.f32 %v286_v32, %v212_v28  ;;  %v357_v35 = vpop.f32.mrb[1].mxu1 }
 0x11b   : > { %v360_v36 = vmax.f32 %v285_v30, 0.0  ;;  %v358_v37 = vadd.f32 %v357_v35, %v212_v28 }
 0x11c   : > { %v362_v38 = vmax.f32 %v356_v33, 0.0  ;;  %v361_v39 = vmax.f32 %v287_v34, 0.0 }
 0x11d   : > { %364 = vst [vmem:[%s188_s20] sm:$0xff] %v360_v36  ;;  %v363_v40 = vmax.f32 %v358_v37, 0.0 }
 0x11e   : > { %366 = vst [vmem:[%s188_s20 + $0x10] sm:$0xff] %v362_v38  ;;  %365 = vst [vmem:[%s188_s20 + $0x8] sm:$0xff] %v361_v39 }
 0x11f   : > { %367 = vst [vmem:[%s188_s20 + $0x18] sm:$0xff] %v363_v40 }
 0x120   : > { %582 = shalt.err (!%p579_p2)
}
 0x121   : > { %s583_s9 = scalar_lea.hbm %s806_s28, 512  ;;  %s587_s23 = scalar_lea.hbm %s852_s3, 2048 }
 0x122   : > { %p584_p4 = scmp.ne.s32.totalorder %s806_s28, %s583_s9  ;;  %p588_p13 = scmp.lt.u32.totalorder %s806_s28, %s852_s3 }
 0x123   : > { %p589_p1 = scmp.lt.u32.totalorder %s587_s23, %s583_s9  ;;  %p591_p6 = scmp.lt.u32.totalorder %s583_s9, %s806_s28 }
 0x124   : > { %p585_p5 = pnand %p584_p4, %p860_p10 }
 0x125   : > { %p590_p3 = por %p589_p1, %p588_p13 }
 0x126   : > { %p586_p7 = pneg %p585_p5 }
 0x127   : > { %p592_p11 = por %p591_p6, %p590_p3 }
 0x129   : > { %p593_p12 = pnand %p592_p11, %p586_p7 }
 0x12b   : > { %596 = shalt.err (!%p593_p12)
}
 0x12c   : > { %489 = dma.vmem_to_hbm [thread:$0]  (%p860_p10), %s808_s22, 512, %s806_s28, %s369_s16  }
 0x12d PF: > { %p500_p8 = scmp.ge.s32.totalorder %s635_s15, 2  ;;  %s395_s7 = sand.u32 1, %s623_s12  }
 0x12e   : > { %p861_p9 = scmp.ne.s32.totalorder %s857_s25, 0  ;;  %s396_s8 = scalar_lea.sflag [#allocation4], %s395_s7 }
 0x130   : > { %p496_p0 = pnand %p500_p8, %p861_p9 }
 0x132   : > { %618 = dma.done.wait (!%p496_p0), %s396_s8, 512  }
 0x133   : > { %620 = vsyncadd (!%p496_p0), %s396_s8, 4294966784  ;;  %p16_p2 = scmp.ge.s32.totalorder %s689_s18, 6   ;;  %s862_s12 = smov %s627_s13 }
 0x134   : > { %s863_s13 = smov %s631_s14  ;;  %s864_s14 = smov %s701_s21 }
 0x135   : > { %s865_s15 = smov %s689_s18  ;;  %18 = sbr.rel (!%p16_p2) target bundleno = 5 (0x5), region = 77 }
 0x13c   :  { %401 = vsyncpa [#allocation3], 1 }
 0x13d   :  { %403 = vsyncpa [#allocation3 + $0x1], 1 }
 0x13e   :  { %404 = vsyncpa [#allocation4], 1 }
 0x13f   :  { %406 = vsyncpa [#allocation4 + $0x1], 1 }

</bundles_post_ra>
